<compile_context>
chip_gen: v7x
topology: tpu7x:2x2x1
jax: 0.10.0
libtpu: 0.0.40
codegen_flags: <defaults>
</compile_context>

<pallas_src>
import functools

import jax
import jax.numpy as jnp
from jax.experimental import pallas as pl
from jax.experimental.pallas import tpu as pltpu

LANE = 128
SUBLANE = 8
NUM_CORES = 2      # megacore split; harmless on 1-TC chips (v5e / v6e)
ROW_TILE = 512     # (512, 128) f32 tile -> ~85% of measured HBM roofline


def _mixed_loss_kernel(x_ref, t_ref, out_ref, acc_ref, *,
                       gamma, n_elems, blocks_per_core, needs_mask):
    c = pl.program_id(0)          # "parallel" core axis
    i = pl.program_id(1)          # "arbitrary" reduction axis
    tr = x_ref.shape[0]

    @pl.when(i == 0)
    def _init():
        acc_ref[...] = jnp.zeros_like(acc_ref)

    x = x_ref[...].astype(jnp.float32)
    t = t_ref[...].astype(jnp.float32)

    # ---- elementwise math: one exp + one log per element ----
    e = jnp.exp(-jnp.abs(x))                       # EUP
    one_pe = 1.0 + e
    inv_1pe = 1.0 / one_pe                         # exact reciprocal
    sig = jnp.where(x >= 0.0, inv_1pe, e * inv_1pe)        # sigmoid(x), stable
    # stable BCE-with-logits:  max(x, 0) - x*t + log(1 + exp(-|x|))
    bce = jnp.maximum(x, 0.0) - x * t + jnp.log(one_pe)    # EUP (log)
    # focal modulating factor:
    #   exp(gamma * logsigmoid(-x*(2t-1))) == (t*(1-sig) + (1-t)*sig)**gamma
    # (exact for binary targets t in {0, 1}; pure VPU for gamma == 2)
    p_wrong = t + sig - 2.0 * t * sig
    if float(gamma) == 2.0:
        fw = p_wrong * p_wrong
    elif float(gamma) == 1.0:
        fw = p_wrong
    else:
        fw = jnp.exp(gamma * jnp.log(jnp.maximum(p_wrong, jnp.float32(1e-30))))
    focal = fw * bce
    st = sig * t

    if needs_mask:
        # Exact validity mask for the ragged tail / virtual boundary blocks.
        base = (c * blocks_per_core + i) * (tr * LANE)
        row = jax.lax.broadcasted_iota(jnp.int32, x.shape, 0)
        lane = jax.lax.broadcasted_iota(jnp.int32, x.shape, 1)
        valid = (row * LANE + lane) < (n_elems - base)
        zero = jnp.zeros_like(x)
        focal = jnp.where(valid, focal, zero)
        st = jnp.where(valid, st, zero)
        sig = jnp.where(valid, sig, zero)
        t = jnp.where(valid, t, zero)

    def blocksum(v):
        # (tr, LANE) -> (SUBLANE, LANE): pure VPU adds, no per-tile XLU reduce
        return v.reshape(tr // SUBLANE, SUBLANE, LANE).sum(axis=0)

    acc_ref[0] += blocksum(focal)   # sum focal loss
    acc_ref[1] += blocksum(st)      # intersection: sum(sigmoid(x) * t)
    acc_ref[2] += blocksum(sig)     # sum(sigmoid(x))
    acc_ref[3] += blocksum(t)       # sum(t)

    @pl.when(i == pl.num_programs(1) - 1)
    def _finalize():
        out_ref[0] = acc_ref[...]   # dump this core's partial-sum slab


def mixed_loss(x, t, *, alpha=10.0, gamma=2.0):
    assert x.shape == t.shape, "target size must match input size"
    n = int(x.size)

    def as_stream(a):
        # keep bf16/f16 streams in their native dtype (upcast on-chip)
        if a.dtype not in (jnp.float32, jnp.bfloat16, jnp.float16):
            a = a.astype(jnp.float32)
        return a.reshape(-1)

    xf = as_stream(x)
    tf = as_stream(t)

    # Pad only the ragged tail up to a whole (8, 128) vreg; zero copies when
    # n % 1024 == 0.
    pad = (-n) % (SUBLANE * LANE)
    if pad:
        xf = jnp.pad(xf, (0, pad))
        tf = jnp.pad(tf, (0, pad))
    rows = (n + pad) // LANE
    x2 = xf.reshape(rows, LANE)
    t2 = tf.reshape(rows, LANE)

    tr = min(ROW_TILE, rows)                      # multiple of 8 by construction
    nblocks = int(pl.cdiv(rows, tr))
    bpc = int(pl.cdiv(nblocks, NUM_CORES))        # blocks per core
    needs_mask = (NUM_CORES * bpc * tr * LANE) != n

    def in_map(c, i):
        # clamp virtual / boundary blocks; their data is masked in-kernel
        return (jnp.minimum(c * bpc + i, nblocks - 1), 0)

    kernel = functools.partial(
        _mixed_loss_kernel,
        gamma=float(gamma), n_elems=n,
        blocks_per_core=bpc, needs_mask=bool(needs_mask))

    partials = pl.pallas_call(
        kernel,
        out_shape=jax.ShapeDtypeStruct((NUM_CORES, 4, SUBLANE, LANE), jnp.float32),
        grid_spec=pltpu.PrefetchScalarGridSpec(
            num_scalar_prefetch=0,
            grid=(NUM_CORES, bpc),
            in_specs=[
                pl.BlockSpec((tr, LANE), in_map),
                pl.BlockSpec((tr, LANE), in_map),
            ],
            out_specs=pl.BlockSpec((1, 4, SUBLANE, LANE),
                                   lambda c, i: (c, 0, 0, 0)),
            scratch_shapes=[pltpu.VMEM((4, SUBLANE, LANE), jnp.float32)],
        ),
        compiler_params=pltpu.CompilerParams(
            dimension_semantics=("parallel", "arbitrary")),
    )(x2, t2)

    # Tiny epilogue on 4 scalars (per-core partials combined here).
    sums = jnp.sum(partials, axis=(0, 2, 3))
    focal_sum, intersection, sig_sum, t_sum = sums[0], sums[1], sums[2], sums[3]
    smooth = 1.0
    focal_mean = focal_sum / n
    dice = (2.0 * intersection + smooth) / (sig_sum + t_sum + smooth)
    return alpha * focal_mean - jnp.log(dice)


def _reference(x, t, alpha, gamma):
    xf = x.reshape(-1).astype(jnp.float32)
    tf = t.reshape(-1).astype(jnp.float32)
    max_val = jnp.maximum(-xf, 0.0)
    bce = xf - xf * tf + max_val + jnp.log(jnp.exp(-max_val) + jnp.exp(-xf - max_val))
    invprobs = jax.nn.log_sigmoid(-xf * (tf * 2.0 - 1.0))
    focal = jnp.mean(jnp.exp(invprobs * gamma) * bce)
    sig = jax.nn.sigmoid(xf)
    dice = (2.0 * jnp.sum(sig * tf) + 1.0) / (jnp.sum(sig) + jnp.sum(tf) + 1.0)
    return alpha * focal - jnp.log(dice)


if __name__ == "__main__":
    ALPHA, GAMMA = 10.0, 2.0   # deterministic MixedLoss(alpha, gamma) hyperparams

    key = jax.random.PRNGKey(0)
    k1, k2 = jax.random.split(key)
    x = jax.random.normal(k1, (2, 4, 16, 16), dtype=jnp.float32)             # logits, NCHW
    t = (jax.random.uniform(k2, (2, 4, 16, 16)) > 0.5).astype(jnp.float32)   # binary target

    loss = mixed_loss(x, t, alpha=ALPHA, gamma=GAMMA)
    loss = jax.block_until_ready(loss)

    expected = _reference(x, t, ALPHA, GAMMA)
    assert jnp.allclose(loss, expected, rtol=1e-5, atol=1e-5), (loss, expected)
    print("KERNEL_OK")
</pallas_src>

<mosaic_0001>
module attributes {stable_mosaic.version = 11 : i64} {
  func.func @_mixed_loss_kernel(%arg0: i32, %arg1: i32, %arg2: memref<16x128xf32, #tpu.memory_space<vmem>>, %arg3: memref<16x128xf32, #tpu.memory_space<vmem>>, %arg4: memref<1x4x8x128xf32, #tpu.memory_space<vmem>>, %arg5: memref<4x8x128xf32, #tpu.memory_space<vmem>>) attributes {dimension_semantics = [#tpu.dimension_semantics<parallel>, #tpu.dimension_semantics<arbitrary>], iteration_bounds = array<i64: 2, 1>, scalar_prefetch = 0 : i64, scratch_operands = 1 : i64, tpu.core_type = #tpu.core_type<tc>, window_params = [{transform_indices = @transform_0, window_bounds = array<i64: 16, 128>}, {transform_indices = @transform_1, window_bounds = array<i64: 16, 128>}, {transform_indices = @transform_2, window_bounds = array<i64: 1, 4, 8, 128>}]} {
    %c0_i32 = arith.constant 0 : i32
    %0 = arith.cmpi eq, %arg1, %c0_i32 : i32
    %1 = arith.extui %0 : i1 to i32
    %c0_i32_0 = arith.constant 0 : i32
    %2 = arith.cmpi ne, %1, %c0_i32_0 : i32
    scf.if %2 {
      %cst_38 = arith.constant 0.000000e+00 : f32
      %82 = vector.broadcast %cst_38 : f32 to vector<4x8x128xf32>
      %c0_39 = arith.constant 0 : index
      %c0_40 = arith.constant 0 : index
      %c0_41 = arith.constant 0 : index
      %83 = vector.load %arg5[%c0_39, %c0_40, %c0_41] : memref<4x8x128xf32, #tpu.memory_space<vmem>>, vector<4x8x128xf32>
      tpu.vector_store %arg5[%c0_39, %c0_40, %c0_41], %82 {strides = array<i32>} : memref<4x8x128xf32, #tpu.memory_space<vmem>>, vector<4x8x128xf32>,
    } else {
    }
    %c0 = arith.constant 0 : index
    %c0_1 = arith.constant 0 : index
    %3 = vector.load %arg2[%c0, %c0_1] : memref<16x128xf32, #tpu.memory_space<vmem>>, vector<16x128xf32>
    %c0_2 = arith.constant 0 : index
    %c0_3 = arith.constant 0 : index
    %4 = vector.load %arg3[%c0_2, %c0_3] : memref<16x128xf32, #tpu.memory_space<vmem>>, vector<16x128xf32>
    %5 = math.absf %3 : vector<16x128xf32>
    %cst = arith.constant 0.000000e+00 : f32
    %6 = vector.broadcast %cst : f32 to vector<16x128xf32>
    %7 = arith.subf %6, %5 : vector<16x128xf32>
    %8 = math.exp %7 : vector<16x128xf32>
    %cst_4 = arith.constant 1.000000e+00 : f32
    %9 = vector.broadcast %cst_4 : f32 to vector<16x128xf32>
    %10 = arith.addf %9, %8 : vector<16x128xf32>
    %cst_5 = arith.constant 1.000000e+00 : f32
    %11 = vector.broadcast %cst_5 : f32 to vector<16x128xf32>
    %12 = arith.divf %11, %10 : vector<16x128xf32>
    %cst_6 = arith.constant 0.000000e+00 : f32
    %13 = vector.broadcast %cst_6 : f32 to vector<16x128xf32>
    %14 = arith.cmpf oge, %3, %13 : vector<16x128xf32>
    %15 = arith.mulf %8, %12 : vector<16x128xf32>
    %16 = arith.select %14, %12, %15 : vector<16x128xi1>, vector<16x128xf32>
    %cst_7 = arith.constant 0.000000e+00 : f32
    %17 = vector.broadcast %cst_7 : f32 to vector<16x128xf32>
    %18 = arith.maximumf %3, %17 : vector<16x128xf32>
    %19 = arith.mulf %3, %4 : vector<16x128xf32>
    %20 = arith.subf %18, %19 : vector<16x128xf32>
    %21 = math.log %10 : vector<16x128xf32>
    %22 = arith.addf %20, %21 : vector<16x128xf32>
    %23 = arith.addf %4, %16 : vector<16x128xf32>
    %cst_8 = arith.constant 2.000000e+00 : f32
    %24 = vector.broadcast %cst_8 : f32 to vector<16x128xf32>
    %25 = arith.mulf %24, %4 : vector<16x128xf32>
    %26 = arith.mulf %25, %16 : vector<16x128xf32>
    %27 = arith.subf %23, %26 : vector<16x128xf32>
    %28 = arith.mulf %27, %27 : vector<16x128xf32>
    %29 = arith.mulf %28, %22 : vector<16x128xf32>
    %30 = arith.mulf %16, %4 : vector<16x128xf32>
    %c1_i32 = arith.constant 1 : i32
    %31 = arith.muli %arg0, %c1_i32 : i32
    %32 = arith.addi %31, %arg1 : i32
    %c2048_i32 = arith.constant 2048 : i32
    %33 = arith.muli %32, %c2048_i32 : i32
    %34 = tpu.iota {dimensions = array<i32: 0>} : vector<16x128xi32>
    %35 = tpu.iota {dimensions = array<i32: 1>} : vector<16x128xi32>
    %c128_i32 = arith.constant 128 : i32
    %36 = vector.broadcast %c128_i32 : i32 to vector<16x128xi32>
    %37 = arith.muli %34, %36 : vector<16x128xi32>
    %38 = arith.addi %37, %35 : vector<16x128xi32>
    %c2048_i32_9 = arith.constant 2048 : i32
    %39 = arith.subi %c2048_i32_9, %33 : i32
    %40 = vector.broadcast %39 : i32 to vector<16x128xi32>
    %41 = arith.cmpi slt, %38, %40 : vector<16x128xi32>
    %cst_10 = arith.constant 0.000000e+00 : f32
    %42 = vector.broadcast %cst_10 : f32 to vector<16x128xf32>
    %43 = arith.select %41, %29, %42 : vector<16x128xi1>, vector<16x128xf32>
    %44 = arith.select %41, %30, %42 : vector<16x128xi1>, vector<16x128xf32>
    %45 = arith.select %41, %16, %42 : vector<16x128xi1>, vector<16x128xf32>
    %46 = arith.select %41, %4, %42 : vector<16x128xi1>, vector<16x128xf32>
    %c0_11 = arith.constant 0 : index
    %c0_12 = arith.constant 0 : index
    %c0_13 = arith.constant 0 : index
    %47 = vector.load %arg5[%c0_11, %c0_12, %c0_13] : memref<4x8x128xf32, #tpu.memory_space<vmem>>, vector<1x8x128xf32>
    %48 = vector.shape_cast %47 : vector<1x8x128xf32> to vector<8x128xf32>
    %49 = vector.shape_cast %43 : vector<16x128xf32> to vector<2x8x128xf32>
    %cst_14 = arith.constant dense<0.000000e+00> : vector<8x128xf32>
    %50 = vector.multi_reduction <add>, %49, %cst_14 [0] : vector<2x8x128xf32> to vector<8x128xf32>
    %51 = arith.addf %48, %50 : vector<8x128xf32>
    %c0_15 = arith.constant 0 : index
    %c0_16 = arith.constant 0 : index
    %c0_17 = arith.constant 0 : index
    %52 = vector.load %arg5[%c0_15, %c0_16, %c0_17] : memref<4x8x128xf32, #tpu.memory_space<vmem>>, vector<1x8x128xf32>
    %53 = vector.shape_cast %52 : vector<1x8x128xf32> to vector<8x128xf32>
    %54 = vector.shape_cast %51 : vector<8x128xf32> to vector<1x8x128xf32>
    tpu.vector_store %arg5[%c0_15, %c0_16, %c0_17], %54 {strides = array<i32>} : memref<4x8x128xf32, #tpu.memory_space<vmem>>, vector<1x8x128xf32>,
    %c1 = arith.constant 1 : index
    %c0_18 = arith.constant 0 : index
    %c0_19 = arith.constant 0 : index
    %55 = vector.load %arg5[%c1, %c0_18, %c0_19] : memref<4x8x128xf32, #tpu.memory_space<vmem>>, vector<1x8x128xf32>
    %56 = vector.shape_cast %55 : vector<1x8x128xf32> to vector<8x128xf32>
    %57 = vector.shape_cast %44 : vector<16x128xf32> to vector<2x8x128xf32>
    %cst_20 = arith.constant dense<0.000000e+00> : vector<8x128xf32>
    %58 = vector.multi_reduction <add>, %57, %cst_20 [0] : vector<2x8x128xf32> to vector<8x128xf32>
    %59 = arith.addf %56, %58 : vector<8x128xf32>
    %c1_21 = arith.constant 1 : index
    %c0_22 = arith.constant 0 : index
    %c0_23 = arith.constant 0 : index
    %60 = vector.load %arg5[%c1_21, %c0_22, %c0_23] : memref<4x8x128xf32, #tpu.memory_space<vmem>>, vector<1x8x128xf32>
    %61 = vector.shape_cast %60 : vector<1x8x128xf32> to vector<8x128xf32>
    %62 = vector.shape_cast %59 : vector<8x128xf32> to vector<1x8x128xf32>
    tpu.vector_store %arg5[%c1_21, %c0_22, %c0_23], %62 {strides = array<i32>} : memref<4x8x128xf32, #tpu.memory_space<vmem>>, vector<1x8x128xf32>,
    %c2 = arith.constant 2 : index
    %c0_24 = arith.constant 0 : index
    %c0_25 = arith.constant 0 : index
    %63 = vector.load %arg5[%c2, %c0_24, %c0_25] : memref<4x8x128xf32, #tpu.memory_space<vmem>>, vector<1x8x128xf32>
    %64 = vector.shape_cast %63 : vector<1x8x128xf32> to vector<8x128xf32>
    %65 = vector.shape_cast %45 : vector<16x128xf32> to vector<2x8x128xf32>
    %cst_26 = arith.constant dense<0.000000e+00> : vector<8x128xf32>
    %66 = vector.multi_reduction <add>, %65, %cst_26 [0] : vector<2x8x128xf32> to vector<8x128xf32>
    %67 = arith.addf %64, %66 : vector<8x128xf32>
    %c2_27 = arith.constant 2 : index
    %c0_28 = arith.constant 0 : index
    %c0_29 = arith.constant 0 : index
    %68 = vector.load %arg5[%c2_27, %c0_28, %c0_29] : memref<4x8x128xf32, #tpu.memory_space<vmem>>, vector<1x8x128xf32>
    %69 = vector.shape_cast %68 : vector<1x8x128xf32> to vector<8x128xf32>
    %70 = vector.shape_cast %67 : vector<8x128xf32> to vector<1x8x128xf32>
    tpu.vector_store %arg5[%c2_27, %c0_28, %c0_29], %70 {strides = array<i32>} : memref<4x8x128xf32, #tpu.memory_space<vmem>>, vector<1x8x128xf32>,
    %c3 = arith.constant 3 : index
    %c0_30 = arith.constant 0 : index
    %c0_31 = arith.constant 0 : index
    %71 = vector.load %arg5[%c3, %c0_30, %c0_31] : memref<4x8x128xf32, #tpu.memory_space<vmem>>, vector<1x8x128xf32>
    %72 = vector.shape_cast %71 : vector<1x8x128xf32> to vector<8x128xf32>
    %73 = vector.shape_cast %46 : vector<16x128xf32> to vector<2x8x128xf32>
    %cst_32 = arith.constant dense<0.000000e+00> : vector<8x128xf32>
    %74 = vector.multi_reduction <add>, %73, %cst_32 [0] : vector<2x8x128xf32> to vector<8x128xf32>
    %75 = arith.addf %72, %74 : vector<8x128xf32>
    %c3_33 = arith.constant 3 : index
    %c0_34 = arith.constant 0 : index
    %c0_35 = arith.constant 0 : index
    %76 = vector.load %arg5[%c3_33, %c0_34, %c0_35] : memref<4x8x128xf32, #tpu.memory_space<vmem>>, vector<1x8x128xf32>
    %77 = vector.shape_cast %76 : vector<1x8x128xf32> to vector<8x128xf32>
    %78 = vector.shape_cast %75 : vector<8x128xf32> to vector<1x8x128xf32>
    tpu.vector_store %arg5[%c3_33, %c0_34, %c0_35], %78 {strides = array<i32>} : memref<4x8x128xf32, #tpu.memory_space<vmem>>, vector<1x8x128xf32>,
    %c0_i32_36 = arith.constant 0 : i32
    %79 = arith.cmpi eq, %arg1, %c0_i32_36 : i32
    %80 = arith.extui %79 : i1 to i32
    %c0_i32_37 = arith.constant 0 : i32
    %81 = arith.cmpi ne, %80, %c0_i32_37 : i32
    scf.if %81 {
      %c0_38 = arith.constant 0 : index
      %c0_39 = arith.constant 0 : index
      %c0_40 = arith.constant 0 : index
      %82 = vector.load %arg5[%c0_38, %c0_39, %c0_40] : memref<4x8x128xf32, #tpu.memory_space<vmem>>, vector<4x8x128xf32>
      %c0_41 = arith.constant 0 : index
      %c0_42 = arith.constant 0 : index
      %c0_43 = arith.constant 0 : index
      %c0_44 = arith.constant 0 : index
      %83 = vector.load %arg4[%c0_41, %c0_42, %c0_43, %c0_44] : memref<1x4x8x128xf32, #tpu.memory_space<vmem>>, vector<1x4x8x128xf32>
      %84 = vector.shape_cast %83 : vector<1x4x8x128xf32> to vector<4x8x128xf32>
      %85 = vector.shape_cast %82 : vector<4x8x128xf32> to vector<1x4x8x128xf32>
      tpu.vector_store %arg4[%c0_41, %c0_42, %c0_43, %c0_44], %85 {strides = array<i32>} : memref<1x4x8x128xf32, #tpu.memory_space<vmem>>, vector<1x4x8x128xf32>,
    } else {
    }
    return
  }
  func.func @transform_0(%arg0: i32, %arg1: i32) -> (i32, i32) {
    %c1_i32 = arith.constant 1 : i32
    %0 = arith.muli %arg0, %c1_i32 : i32
    %1 = arith.addi %0, %arg1 : i32
    %c0_i32 = arith.constant 0 : i32
    %2 = arith.minsi %1, %c0_i32 : i32
    %c0_i32_0 = arith.constant 0 : i32
    %c0_i32_1 = arith.constant 0 : i32
    return %2, %c0_i32_0 : i32, i32
  }
  func.func @transform_1(%arg0: i32, %arg1: i32) -> (i32, i32) {
    %c1_i32 = arith.constant 1 : i32
    %0 = arith.muli %arg0, %c1_i32 : i32
    %1 = arith.addi %0, %arg1 : i32
    %c0_i32 = arith.constant 0 : i32
    %2 = arith.minsi %1, %c0_i32 : i32
    %c0_i32_0 = arith.constant 0 : i32
    %c0_i32_1 = arith.constant 0 : i32
    return %2, %c0_i32_0 : i32, i32
  }
  func.func @transform_2(%arg0: i32, %arg1: i32) -> (i32, i32, i32, i32) {
    %c0_i32 = arith.constant 0 : i32
    %c0_i32_0 = arith.constant 0 : i32
    %c0_i32_1 = arith.constant 0 : i32
    %c0_i32_2 = arith.constant 0 : i32
    return %arg0, %c0_i32, %c0_i32_0, %c0_i32_1 : i32, i32, i32, i32
  }
}

</mosaic_0001>

<bundles_post_ra>
// kernel: tpu_custom_call.1
= control target key start
LH: loop header
LB: loop body
LE: loop exit
PB: predicated region body
PF: predicated region fallthrough
CT: control target
= control target key end

     0   :  { %7 = vsyncpa [#allocation4], 0  ;;  %s1032_s0 = inlined_call_operand.hbm [shape: f32[16,128], index: 0, kind: input, shape index: {}]   ;;  %s1033_s1 = inlined_call_operand.hbm [shape: f32[16,128], index: 1, kind: input, shape index: {}]   ;;  %s1034_s2 = inlined_call_operand.hbm [shape: f32[2,4,8,128], index: 2, kind: output, shape index: {}]  }
   0x1   :  { %9 = vsyncpa [#allocation4 + $0x1], 0 }
   0x2   :  { %10 = vsyncpa [#allocation7], 0 }
   0x3   :  { %12 = vsyncpa [#allocation7 + $0x1], 0 }
   0x4   :  { %13 = vsyncpa [#allocation5], 0 }
   0x5   :  { %15 = vsyncpa [#allocation5 + $0x1], 0  ;;  %s790_s9 = smov 0   ;;  %s792_s10 = smov 0  }
   0x6   :  { %s794_s11 = smov 0   ;;  %s796_s12 = smov 0  }
   0x7   :  { %s798_s13 = smov 0   ;;  %s800_s14 = smov 0  }
   0x8   :  { %s802_s15 = smov 0   ;;  %s804_s16 = smov 0  }
   0x9 LB: > { %s469_s17 = sadd.s32 4294967295, %s766_s16   ;;  %s470_s18 = sadd.s32 4294967294, %s766_s16   ;;  %s766_s16 = sphi %s804_s16, %s21_s16   ;;  %s762_s15 = sphi %s802_s15, %s1057_s15   ;;  %s758_s14 = sphi %s800_s14, %s1056_s14   ;;  %s754_s13 = sphi %s798_s13, %s1022_s13   ;;  %s750_s12 = sphi %s796_s12, %s1055_s12   ;;  %s746_s11 = sphi %s794_s11, %s1054_s11   ;;  %s742_s10 = sphi %s792_s10, %s1053_s10   ;;  %s738_s9 = sphi %s790_s9, %s1052_s9  }
   0xa   : > { %s33_s19 = sadd.s32 1, %s762_s15  ;;  %p735_p1 = scmp.ne.s32.totalorder %s754_s13, 0 }
   0xb   : > { %p35_p0 = scmp.ge.s32.totalorder %s33_s19, 2  ;;  %p54_p2 = scmp.eq.s32.totalorder %s766_s16, 0 }
   0xc   : > { %p59_p3 = scmp.ne.s32.totalorder %s754_s13, %s750_s12  ;;  %p60_p5 = scmp.eq.s32.totalorder %s469_s17, 0 }
   0xd   : > { %s1059_s19 = smov (%p35_p0, %s33_s19), 0  ;;  %p836_p4 = por %p735_p1, %p54_p2 }
   0xe   : > { %p840_p6 = por %p60_p5, %p59_p3  ;;  %s101_s22 = ssub.s32 %s762_s15, %s1059_s19 }
   0xf   : > { %p102_p7 = scmp.eq.s32.totalorder %s101_s22, 0  ;;  %s104_s23 = sadd.s32 1, %s746_s11 }
  0x10   : > { %s1038_s21 = scalar_select %p840_p6, 1, 0 }
  0x11   : > { %s848_s24 = scalar_select %p102_p7, %s746_s11, %s104_s23  }
  0x12   : > { %p114_p8 = scmp.ne.s32.totalorder %s746_s11, %s742_s10  ;;  %p115_p9 = scmp.eq.s32.totalorder %s469_s17, 1 }
  0x13   : > { %p120_p10 = scmp.ne.s32.totalorder %s742_s10, %s738_s9  ;;  %p121_p11 = scmp.eq.s32.totalorder %s470_s18, 1 }
  0x14   : > { %p854_p12 = por %p115_p9, %p114_p8  ;;  %p509_p1 = scmp.lt.s32.totalorder %s766_s16, 2 }
  0x15   : > { %p859_p0 = por %p121_p11, %p120_p10  ;;  %s768_s27 = smov [#allocation3]  }
  0x16   : > { %s1039_s25 = scalar_select %p854_p12, 1, 0 }
  0x17   : > { %s1040_s26 = scalar_select %p859_p0, 1, 0 }
  0x18   : > { %s155_s28 = sshll.u32 %s768_s27, 4  ;;  %p866_p2 = pnand %p509_p1, %p836_p4  ;;  %s156_s28 = int_to_ptr.vmem [resolvable:$true] %s155_s28 }
  0x19   : > { %s599_s4 = scalar_lea.hbm %s1032_s0, 256 }
  0x1a   : > { %p600_p3 = scmp.ne.s32.totalorder %s1032_s0, %s599_s4  ;;  %p601_p5 = pneg %p866_p2 }
  0x1b   : > { %p606_p8 = scmp.lt.u32.totalorder %s599_s4, %s599_s4  ;;  %p608_p9 = scmp.lt.u32.totalorder %s599_s4, %s1032_s0 }
  0x1c   : > { %p602_p7 = pnand %p601_p5, %p600_p3 }
  0x1d   : > { %p609_p10 = por %p608_p9, %p606_p8 }
  0x1e   : > { %p603_p4 = pneg %p602_p7 }
  0x20   : > { %p610_p11 = pnand %p609_p10, %p603_p4 }
  0x22   : > { %613 = shalt.err (!%p610_p11)
}
  0x23   : > { %s614_s12 = scalar_lea.vmem %s156_s28, 256  ;;  %s621_s17 = scalar_lea.vmem %s156_s28, 512 }
  0x24   : > { %p615_p1 = scmp.ne.s32.totalorder %s156_s28, %s614_s12  ;;  %p622_p12 = scmp.lt.s32.totalorder %s156_s28, %s156_s28 }
  0x25   : > { %p623_p6 = scmp.lt.s32.totalorder %s621_s17, %s614_s12 }
  0x26   : > { %p617_p13 = pnand %p615_p1, %p601_p5 }
  0x27   : > { %p624_p3 = por %p623_p6, %p622_p12 }
  0x28   : > { %p618_p0 = pneg %p617_p13 }
  0x2a   : > { %p625_p7 = pnand %p624_p3, %p618_p0 }
  0x2c   : > { %628 = shalt.err (!%p625_p7)
}
  0x2d   : > { %s769_s18 = smov 128   ;;  %s770_s20 = smov 8  }
  0x2e   : > { %501 = dma.hbm_to_vmem [thread:$0]  (!%p866_p2), %s1032_s0, 256, %s156_s28, [#allocation4], %s769_s18, %s769_s18, %s770_s20  }
  0x2f   : > { %p479_p13 = scmp.ge.s32.totalorder %s766_s16, 1  ;;  %p187_p4 = scmp.lt.s32.totalorder %s766_s16, 3 }
  0x30   : > { %s771_s30 = smov [#allocation6]   ;;  %s629_s6 = scalar_lea.hbm %s1033_s1, 256 }
  0x31   : > { %p897_p8 = pnand %p479_p13, %p187_p4  ;;  %s179_s3 = sshll.u32 %s771_s30, 4  ;;  %s180_s3 = int_to_ptr.vmem [resolvable:$true] %s179_s3 }
  0x32   : > { %p630_p6 = scmp.ne.s32.totalorder %s1033_s1, %s629_s6  ;;  %p636_p9 = scmp.lt.u32.totalorder %s629_s6, %s629_s6 }
  0x33   : > { %s1042_s27 = scalar_select %p897_p8, 1, 0 }
  0x34   : > { %p632_p12 = pnand %p630_p6, %p601_p5  ;;  %p638_p10 = scmp.lt.u32.totalorder %s629_s6, %s1033_s1 }
  0x36   : > { %p633_p0 = pneg %p632_p12  ;;  %p639_p11 = por %p638_p10, %p636_p9 }
  0x38   : > { %p640_p1 = pnand %p639_p11, %p633_p0 }
  0x3a   : > { %643 = shalt.err (!%p640_p1)
}
  0x3b   : > { %s644_s17 = scalar_lea.vmem %s180_s3, 256  ;;  %s651_s22 = scalar_lea.vmem %s180_s3, 512 }
  0x3c   : > { %p645_p3 = scmp.ne.s32.totalorder %s180_s3, %s644_s17  ;;  %p652_p4 = scmp.lt.s32.totalorder %s180_s3, %s180_s3 }
  0x3d   : > { %p653_p8 = scmp.lt.s32.totalorder %s651_s22, %s644_s17 }
  0x3e   : > { %p647_p7 = pnand %p645_p3, %p601_p5 }
  0x3f   : > { %p654_p6 = por %p653_p8, %p652_p4 }
  0x40   : > { %p648_p13 = pneg %p647_p7 }
  0x42   : > { %p655_p12 = pnand %p654_p6, %p648_p13 }
  0x44   : > { %658 = shalt.err (!%p655_p12)
}
  0x45   : > { %504 = dma.hbm_to_vmem [thread:$0]  (!%p866_p2), %s1033_s1, 256, %s180_s3, [#allocation7], %s769_s18, %s769_s18, %s770_s20  }
  0x46   : > { %p1043_p0 = scmp.ne.s32.totalorder %s1042_s27, 0 }
  0x47   : > { %s193_s4 = sand.u32 (!%p1043_p0), 1, %s754_s13   ;;  %p1044_p5 = scmp.ne.s32.totalorder (!%p1043_p0), %s1038_s21, 0 }
  0x48   : > { %191 = sbr.rel (%p1043_p0) target bundleno = 143 (0x8f), region = 28  ;;  %s480_s5 = sshll.u32 (!%p1043_p0), %s193_s4, 4 }
  0x49   : > { %s194_s6 = scalar_lea.sflag (!%p1043_p0), [#allocation4], %s193_s4  ;;  %s197_s7 = scalar_lea.vmem (!%p1043_p0), [#allocation3], %s480_s5 }
  0x4f   : > { %724 = dma.done.wait (%p1044_p5), %s194_s6, 256  }
  0x50   : > { %726 = vsyncadd (%p1044_p5), %s194_s6, 4294967040  ;;  %s203_s29 = scalar_lea.sflag [#allocation7], %s193_s4  ;;  %s206_s8 = scalar_lea.vmem [#allocation6], %s480_s5 }
  0x51   : > { %728 = dma.done.wait (%p1044_p5), %s203_s29, 256  }
  0x52   : > { %730 = vsyncadd (%p1044_p5), %s203_s29, 4294967040  ;;  %v300_v0 = vlaneseq  ;;  %s483_s18 = sshll.u32 %s758_s14, 11  ;;  %v248_v5 = vld [vmem:[%s197_s7] sm:$0xff]  ;;  %v249_v6 = vld [vmem:[%s197_s7 + $0x8] sm:$0xff]  ;;  %s229_s27 = sand.u32 1, %s742_s10  }
  0x53   : > { %s309_s20 = ssub.s32 2048, %s483_s18  ;;  %v252_v9 = vand.u32 2147483647, %v248_v5  ;;  %v253_v10 = vand.u32 2147483647, %v249_v6  ;;  %s482_s21 = sshll.u32 %s229_s27, 5 }
  0x54   : > { %v301_v1 = vshrl.u32 %v300_v0, 7  ;;  %v304_v2 = vand.u32 127, %v300_v0  ;;  %v310_v11 = vstv %s309_s20  ;;  %v250_v14 = vld [vmem:[%s206_s8] sm:$0xff]  ;;  %v251_v20 = vld [vmem:[%s206_s8 + $0x8] sm:$0xff]  ;;  %s951_s3 = scalar_lea.vmem [#allocation8], %s482_s21  ;;  %v272_v28 = vmax.f32 %v248_v5, 0.0 }
  0x55   : > { %v254_v12 = vsub.f32 0.0, %v252_v9  ;;  %v255_v13 = vsub.f32 0.0, %v253_v10  ;;  %v274_v29 = vmul.f32 %v250_v14, %v248_v5  ;;  %v273_v30 = vmax.f32 %v249_v6, 0.0  ;;  %s365_s28 = sshll.u32 %s951_s3, 4  ;;  %s491_s12 = sshll.u32 %s758_s14, 9  ;;  %s970_s28 = int_to_ptr.vmem [resolvable:$true] %s365_s28 }
  0x56   : > { %v302_v3 = vadd.s32 8, %v301_v1  ;;  %v305_v4 = vmul.u32 128, %v301_v1  ;;  %v275_v31 = vmul.f32 %v251_v20, %v249_v6  ;;  %vm266_vm2 = vcmp.ge.f32.partialorder %v248_v5, 0.0  ;;  %s975_s23 = scalar_lea.hbm %s1034_s2, %s491_s12  ;;  %s980_s14 = scalar_lea.sflag [#allocation5], %s229_s27 }
  0x57   : > { %v256_v17 = vmul.f32 1.442695, %v254_v12  ;;  %v258_v18 = vmul.f32 1.442695, %v255_v13  ;;  %v286_v33 = vmul.f32 2.0, %v250_v14  ;;  %vm267_vm3 = vcmp.ge.f32.partialorder %v249_v6, 0.0 }
  0x58   : > { %v306_v7 = vmul.u32 128, %v302_v3  ;;  %v307_v8 = vadd.s32 %v305_v4, %v304_v2  ;;  %v287_v36 = vmul.f32 2.0, %v251_v20  ;;  %v276_v39 = vsub.f32 %v272_v28, %v274_v29  ;;  %s659_s30 = scalar_lea.vmem %s970_s28, 512  ;;  %p1049_p8 = scmp.ne.s32.totalorder %s1039_s25, 0 }
  0x59   : > { %587 = vpow2.f32 %v256_v17  ;;  %v277_v42 = vsub.f32 %v273_v30, %v275_v31  ;;  %p660_p2 = scmp.ne.s32.totalorder %s970_s28, %s659_s30  ;;  %s772_s4 = smov [#allocation8]  }
  0x5a   : > { %v308_v15 = vadd.s32 %v306_v7, %v304_v2  ;;  %vm939_vm0 = vcmp.lt.s32.totalorder %v307_v8, %v310_v11  ;;  %589 = vpow2.f32 %v258_v18  ;;  %s663_s5 = sshll.u32 %s772_s4, 4  ;;  %s664_s5 = int_to_ptr.vmem [resolvable:$false] %s663_s5 }
  0x5b   : > { %v319_v19 = vsel %vm939_vm0, %v250_v14, 0.0  ;;  %p661_p9 = pnand %p660_p2, %p1049_p8  ;;  %s665_s6 = scalar_lea.vmem %s664_s5, 1024 }
  0x5c   : > { %vm945_vm1 = vcmp.lt.s32.totalorder %v308_v15, %v310_v11  ;;  %p666_p11 = scmp.lt.s32.totalorder %s970_s28, %s664_s5  ;;  %p667_p1 = scmp.lt.s32.totalorder %s665_s6, %s659_s30 }
  0x5d   : > { %v320_v22 = vsel %vm945_vm1, %v251_v20, 0.0  ;;  %p662_p10 = pneg %p661_p9 }
  0x5e   : > { %v337_v23 = vadd.f32 %v320_v22, %v319_v19  ;;  %p668_p3 = por %p667_p1, %p666_p11 }
  0x60   : > { %350 = vst [vmem:[%s951_s3 + $0x18] sm:$0xff] %v337_v23  ;;  %p669_p7 = pnand %p668_p3, %p662_p10 }
  0x63   : > { %v588_v24 = vpop.eup %587 }
  0x64   : > { %v590_v25 = vpop.eup %589  ;;  %v260_v26 = vadd.f32 1.0, %v588_v24 }
  0x65   : > { %v261_v27 = vadd.f32 1.0, %v590_v25 }
  0x66   : > { %591 = vrcp.f32 %v260_v26 }
  0x67   : > { %593 = vrcp.f32 %v261_v27 }
  0x68   : > { %595 = vlog2.f32 %v260_v26 }
  0x69   : > { %597 = vlog2.f32 %v261_v27 }
  0x70   : > { %v592_v32 = vpop.eup %591 }
  0x71   : > { %v594_v34 = vpop.eup %593  ;;  %v268_v35 = vmul.f32 %v592_v32, %v588_v24 }
  0x72   : > { %v596_v37 = vpop.eup %595  ;;  %v269_v38 = vmul.f32 %v594_v34, %v590_v25 }
  0x73   : > { %v598_v40 = vpop.eup %597  ;;  %v270_v41 = vsel %vm266_vm2, %v592_v32, %v268_v35  ;;  %v279_v43 = vmul.f32 0.6931472, %v596_v37 }
  0x74   : > { %v271_v44 = vsel %vm267_vm3, %v594_v34, %v269_v38  ;;  %v281_v45 = vmul.f32 0.6931472, %v598_v40  ;;  %v284_v46 = vadd.f32 %v270_v41, %v250_v14  ;;  %v288_v47 = vmul.f32 %v286_v33, %v270_v41 }
  0x75   : > { %v285_v48 = vadd.f32 %v271_v44, %v251_v20  ;;  %v289_v49 = vmul.f32 %v287_v36, %v271_v44  ;;  %v296_v50 = vmul.f32 %v270_v41, %v250_v14  ;;  %v282_v51 = vadd.f32 %v279_v43, %v276_v39 }
  0x76   : > { %v290_v52 = vsub.f32 %v284_v46, %v288_v47  ;;  %v297_v53 = vmul.f32 %v271_v44, %v251_v20  ;;  %v317_v54 = vsel %vm939_vm0, %v270_v41, 0.0  ;;  %v283_v55 = vadd.f32 %v281_v45, %v277_v42 }
  0x77   : > { %v291_v56 = vsub.f32 %v285_v48, %v289_v49  ;;  %v315_v57 = vsel %vm939_vm0, %v296_v50, 0.0  ;;  %v318_v58 = vsel %vm945_vm1, %v271_v44, 0.0 }
  0x78   : > { %v292_v59 = vmul.f32 %v290_v52, %v290_v52  ;;  %v316_v60 = vsel %vm945_vm1, %v297_v53, 0.0  ;;  %v332_v61 = vadd.f32 %v318_v58, %v317_v54 }
  0x79   : > { %v293_v62 = vmul.f32 %v291_v56, %v291_v56  ;;  %v327_v63 = vadd.f32 %v316_v60, %v315_v57 }
  0x7a   : > { %v294_v0 = vmul.f32 %v292_v59, %v282_v51  ;;  %349 = vst [vmem:[%s951_s3 + $0x10] sm:$0xff] %v332_v61 }
  0x7b   : > { %v295_v1 = vmul.f32 %v293_v62, %v283_v55  ;;  %348 = vst [vmem:[%s951_s3 + $0x8] sm:$0xff] %v327_v63 }
  0x7c   : > { %v313_v2 = vsel %vm939_vm0, %v294_v0, 0.0 }
  0x7d   : > { %v314_v3 = vsel %vm945_vm1, %v295_v1, 0.0 }
  0x7e   : > { %v322_v4 = vadd.f32 %v314_v3, %v313_v2 }
  0x80   : > { %347 = vst [vmem:[%s951_s3] sm:$0xff] %v322_v4 }
  0x81   : > { %672 = shalt.err (!%p669_p7)
}
  0x82   : > { %s673_s7 = scalar_lea.hbm %s975_s23, 512  ;;  %s677_s18 = scalar_lea.hbm %s1034_s2, 1024 }
  0x83   : > { %p674_p13 = scmp.ne.s32.totalorder %s975_s23, %s673_s7  ;;  %p678_p12 = scmp.lt.u32.totalorder %s975_s23, %s1034_s2 }
  0x84   : > { %p679_p0 = scmp.lt.u32.totalorder %s677_s18, %s673_s7  ;;  %p681_p2 = scmp.lt.u32.totalorder %s673_s7, %s975_s23 }
  0x85   : > { %p675_p4 = pnand %p674_p13, %p1049_p8 }
  0x86   : > { %p680_p5 = por %p679_p0, %p678_p12 }
  0x87   : > { %p676_p6 = pneg %p675_p4 }
  0x88   : > { %p682_p9 = por %p681_p2, %p680_p5 }
  0x8a   : > { %p683_p10 = pnand %p682_p9, %p676_p6 }
  0x8c   : > { %686 = shalt.err (!%p683_p10)
}
  0x8d   : > { %s773_s21 = smov 128   ;;  %s774_s3 = smov 8  }
  0x8e   : > { %496 = dma.vmem_to_hbm [thread:$0]  (%p1049_p8), %s970_s28, 512, %s975_s23, %s980_s14, %s773_s21, %s773_s21, %s774_s3  }
  0x8f PF: > { %s380_s12 = sand.u32 1, %s738_s9   ;;  %p1050_p11 = scmp.ne.s32.totalorder %s1040_s26, 0 }
  0x90   : > { %p1051_p1 = scmp.ge.s32.totalorder %s766_s16, 2  ;;  %s381_s17 = scalar_lea.sflag [#allocation5], %s380_s12 }
  0x92   : > { %p506_p3 = pnand %p1051_p1, %p1050_p11 }
  0x94   : > { %732 = dma.done.wait (!%p506_p3), %s381_s17, 512  }
  0x95   : > { %734 = vsyncadd (!%p506_p3), %s381_s17, 4294966784  ;;  %s21_s16 = sadd.s32 1, %s766_s16   ;;  %s1052_s9 = smov %s742_s10 }
  0x96   : > { %p18_p7 = scmp.ge.s32.totalorder %s21_s16, 4   ;;  %s1053_s10 = smov %s746_s11 }
  0x97   : > { %s1054_s11 = smov %s848_s24  ;;  %s1055_s12 = smov %s754_s13 }
  0x98   : > { %s1022_s13 = smov 0   ;;  %s1056_s14 = smov %s762_s15 }
  0x99   : > { %s1057_s15 = smov %s1059_s19  ;;  %20 = sbr.rel (!%p18_p7) target bundleno = 9 (0x9), region = 97 }
  0xa0   :  { %386 = vsyncpa [#allocation4], 1 }
  0xa1   :  { %388 = vsyncpa [#allocation4 + $0x1], 1 }
  0xa2   :  { %389 = vsyncpa [#allocation7], 1 }
  0xa3   :  { %391 = vsyncpa [#allocation7 + $0x1], 1 }
  0xa4   :  { %392 = vsyncpa [#allocation5], 1 }
  0xa5   :  { %394 = vsyncpa [#allocation5 + $0x1], 1 }

</bundles_post_ra>
